<compile_context>
chip_gen: v5e
topology: v5e:2x2
jax: 0.10.0
libtpu: 0.0.40
codegen_flags: <defaults>
</compile_context>

<pallas_src>
import math
import functools

import jax
import jax.numpy as jnp
from jax import lax
from jax.experimental import pallas as pl
from jax.experimental.pallas import tpu as pltpu


def _round_up(x: int, m: int) -> int:
    return ((x + m - 1) // m) * m


def _poly_kernel(x_ref, w_ref, b_ref, o_ref, *, degree, k_total, block_k, mask_k):
    """One (bm, bn) output tile. Grid = (M-blocks, N-blocks, K-blocks), K last and
    'arbitrary'. The f32 output block is resident across K and is the accumulator."""
    k = pl.program_id(2)

    @pl.when(k == 0)
    def _init():
        o_ref[...] = jnp.zeros_like(o_ref)

    # MXU-native bf16 operands (no-op cast if already bf16), f32 accumulation.
    x_tile = x_ref[...].astype(jnp.bfloat16)
    w_tile = w_ref[...].astype(jnp.bfloat16)

    if mask_k:
        # K not a multiple of block_k: zero the out-of-range K region of BOTH
        # operands so stale VMEM bits (possibly NaN/Inf) in the partially filled
        # edge block cannot corrupt the accumulation.  Identity on non-edge
        # steps; cheap VPU work hidden under the MXU.
        k_off = k * block_k
        col = lax.broadcasted_iota(jnp.int32, x_tile.shape, 1) + k_off
        x_tile = jnp.where(col < k_total, x_tile, jnp.zeros_like(x_tile))
        row = lax.broadcasted_iota(jnp.int32, w_tile.shape, 0) + k_off
        w_tile = jnp.where(row < k_total, w_tile, jnp.zeros_like(w_tile))

    o_ref[...] += jnp.dot(x_tile, w_tile, preferred_element_type=jnp.float32)

    @pl.when(k == pl.num_programs(2) - 1)
    def _epilogue():
        proj = o_ref[...] + b_ref[...]          # (1, bn) bias broadcasts over rows
        if float(degree) == int(degree):
            o_ref[...] = lax.integer_pow(proj, int(degree))
        else:
            # TODO(synk): non-integer degree falls back to the exp/log (EUP) power path.
            o_ref[...] = jnp.power(proj, jnp.float32(degree))


def kernel_mapping_polynomial(x, W, b, *, degree=2,
                              block_m=512, block_n=1024, block_k=512,
                              w_buffers=None):
    """Compute (x @ W + b) ** degree with a tiled Pallas TPU kernel.

    x: [M, K], W: [K, N], b: [N].  MXU runs in bf16 with f32 accumulation; the
    result is returned in f32 (documented accuracy trade-off vs. a true-f32
    matmul, which is emulated and ~3-6x slower on the MXU).
    """
    M, K = x.shape
    K2, N = W.shape
    assert K == K2 and b.shape == (N,)

    # ---- tile sizes ----------------------------------------------------------
    # bf16 operands need sublane multiples of 16; lanes multiples of 128.
    # Defaults are 256-multiples (MXU-native on v6e/v7x, still 128-aligned on
    # v5e) and are clamped so tiny problems stay tiny.
    bm = min(_round_up(block_m, 16), _round_up(M, 16))
    bn = min(_round_up(block_n, 128), _round_up(N, 128))
    bk = min(_round_up(block_k, 128), _round_up(K, 128))

    # ---- generation-aware VMEM budget ---------------------------------------
    try:
        vmem_cap = int(pltpu.get_tpu_info().vmem_capacity_bytes)
    except Exception:
        vmem_cap = 64 * 1024 * 1024                 # assume smallest (v7x) VMEM
    # ~48 MiB on v7x (64 MiB physical), ~96 MiB on v5e/v6e (128 MiB physical).
    vmem_limit = min((vmem_cap * 3) // 4, 96 * 1024 * 1024)

    def _footprint(bm_, bn_, bk_):                  # conservative: f32 operands
        return (2 * bm_ * bk_ * 4      # double-buffered x tile
                + 2 * bk_ * bn_ * 4    # double-buffered W tile
                + 2 * bm_ * bn_ * 4    # resident f32 output / accumulator block
                + 2 * 8 * bn_ * 4)     # (1, bn) bias pads to 8 sublanes

    budget = (vmem_limit * 3) // 4
    while _footprint(bm, bn, bk) > budget:
        if bn >= max(bk, 256):
            bn = _round_up(bn // 2, 128)
        elif bk >= 256:
            bk = _round_up(bk // 2, 128)
        elif bm > 16:
            bm = _round_up(bm // 2, 16)
        else:
            break

    # ---- keep v7x's two TensorCores busy (best effort) -----------------------
    for _ in range(8):
        if pl.cdiv(M, bm) * pl.cdiv(N, bn) >= 2:
            break
        new_bn = _round_up(max(bn // 2, 128), 128)
        new_bm = _round_up(max(bm // 2, 16), 16)
        if new_bn < bn and pl.cdiv(N, new_bn) >= 2:
            bn = new_bn
        elif new_bm < bm and pl.cdiv(M, new_bm) >= 2:
            bm = new_bm
        else:
            break   # problem too small to split (e.g. M <= 16, N <= 128)

    grid_m, grid_n, grid_k = pl.cdiv(M, bm), pl.cdiv(N, bn), pl.cdiv(K, bk)
    mask_k = (K % bk) != 0

    # ---- operand dtypes -------------------------------------------------------
    # Pre-cast to bf16 in HBM only when the operand is re-streamed (>1 passes);
    # the one-off cast pass then pays for itself by halving repeated HBM reads.
    # Otherwise keep the user dtype (zero wrapper-side copies) and cast per-tile
    # in the kernel.  No jnp.pad anywhere.
    xb = x.astype(jnp.bfloat16) if (x.dtype != jnp.bfloat16 and grid_n > 1) else x
    Wb = W.astype(jnp.bfloat16) if (W.dtype != jnp.bfloat16 and grid_m > 1) else W
    b2d = b.astype(jnp.float32).reshape(1, N)

    is_int_deg = float(degree) == int(degree)
    cost = pl.CostEstimate(
        flops=2 * M * K * N + 3 * M * N,
        transcendentals=0 if is_int_deg else 2 * M * N,
        bytes_accessed=(grid_n * M * K * xb.dtype.itemsize     # x re-streamed per N-block
                        + grid_m * K * N * Wb.dtype.itemsize   # W re-streamed per M-block
                        + M * N * 4 + N * 4),
    )

    w_spec_kwargs = {}
    if w_buffers is not None and w_buffers != 2:
        # Optional deeper buffering on the streamed W operand for skinny-M,
        # bandwidth-bound shapes (sweep; keep 2 on v7x if VMEM is tight).
        w_spec_kwargs["pipeline_mode"] = pl.Buffered(w_buffers)

    out = pl.pallas_call(
        functools.partial(_poly_kernel, degree=degree, k_total=K,
                          block_k=bk, mask_k=mask_k),
        out_shape=jax.ShapeDtypeStruct((M, N), jnp.float32),
        grid_spec=pltpu.PrefetchScalarGridSpec(
            num_scalar_prefetch=0,
            grid=(grid_m, grid_n, grid_k),
            in_specs=[
                pl.BlockSpec((bm, bk), lambda i, j, k: (i, k)),                   # x tile
                pl.BlockSpec((bk, bn), lambda i, j, k: (k, j), **w_spec_kwargs),  # W tile
                pl.BlockSpec((1, bn), lambda i, j, k: (0, j)),                    # bias row
            ],
            out_specs=pl.BlockSpec((bm, bn), lambda i, j, k: (i, j)),
        ),
        compiler_params=pltpu.CompilerParams(
            dimension_semantics=("parallel", "parallel", "arbitrary"),
            vmem_limit_bytes=vmem_limit,
        ),
        cost_estimate=cost,
    )(xb, Wb, b2d)
    return out


def _reference(x, W, b, degree):
    # Matches the kernel numerics: bf16 operands on the MXU, f32 accumulation.
    proj = jnp.dot(x.astype(jnp.bfloat16), W.astype(jnp.bfloat16),
                   preferred_element_type=jnp.float32) + b.astype(jnp.float32)
    if float(degree) == int(degree):
        return lax.integer_pow(proj, int(degree))
    return jnp.power(proj, jnp.float32(degree))


if __name__ == "__main__":
    key = jax.random.PRNGKey(0)

    # --- Test 1: module-sized small demo (matches the PyTorch __init__) -------
    input_dim, output_dim, degree, gamma, batch = 32, 128, 2, 1.0, 8
    kx, kw, kb, k2 = jax.random.split(key, 4)

    W = jax.random.normal(kw, (input_dim, output_dim), jnp.float32) * math.sqrt(2 * gamma)
    b = 2.0 * math.pi * jax.random.uniform(kb, (output_dim,), jnp.float32)
    x = jax.random.normal(kx, (batch, input_dim), jnp.float32)

    out = jax.block_until_ready(kernel_mapping_polynomial(x, W, b, degree=degree))
    ref = _reference(x, W, b, degree)
    assert out.shape == (batch, output_dim)
    assert jnp.allclose(out, ref, rtol=5e-3, atol=1e-2), "mismatch vs reference (test 1)"

    # --- Test 2: ragged shapes -> partial M/K edge blocks, no wrapper padding --
    M2, K2_, N2, deg2 = 260, 200, 384, 3
    ka, kbw, kbb = jax.random.split(k2, 3)
    x2 = jax.random.normal(ka, (M2, K2_), jnp.float32)
    W2 = jax.random.normal(kbw, (K2_, N2), jnp.float32) * math.sqrt(2 * gamma)
    b2 = 2.0 * math.pi * jax.random.uniform(kbb, (N2,), jnp.float32)

    out2 = jax.block_until_ready(
        kernel_mapping_polynomial(x2, W2, b2, degree=deg2,
                                  block_m=128, block_n=128, block_k=128))
    ref2 = _reference(x2, W2, b2, deg2)
    assert out2.shape == (M2, N2)
    rel = jnp.max(jnp.abs(out2 - ref2)) / (jnp.max(jnp.abs(ref2)) + 1e-6)
    assert rel < 1e-3, f"mismatch vs reference (test 2): rel max diff {rel}"

    print("KERNEL_OK")
</pallas_src>

<mosaic_0001>
module attributes {stable_mosaic.version = 11 : i64} {
  func.func @_poly_kernel(%arg0: i32, %arg1: i32, %arg2: i32, %arg3: memref<16x128xf32, #tpu.memory_space<vmem>>, %arg4: memref<128x128xf32, #tpu.memory_space<vmem>>, %arg5: memref<1x128xf32, #tpu.memory_space<vmem>>, %arg6: memref<16x128xf32, #tpu.memory_space<vmem>>) attributes {dimension_semantics = [#tpu.dimension_semantics<parallel>, #tpu.dimension_semantics<parallel>, #tpu.dimension_semantics<arbitrary>], iteration_bounds = array<i64: 1, 1, 1>, scalar_prefetch = 0 : i64, scratch_operands = 0 : i64, tpu.core_type = #tpu.core_type<tc>, window_params = [{transform_indices = @transform_0, window_bounds = array<i64: 16, 128>}, {transform_indices = @transform_1, window_bounds = array<i64: 128, 128>}, {transform_indices = @transform_2, window_bounds = array<i64: 1, 128>}, {transform_indices = @transform_3, window_bounds = array<i64: 16, 128>}]} {
    %c0_i32 = arith.constant 0 : i32
    %0 = arith.cmpi eq, %arg2, %c0_i32 : i32
    %1 = arith.extui %0 : i1 to i32
    %c0_i32_0 = arith.constant 0 : i32
    %2 = arith.cmpi ne, %1, %c0_i32_0 : i32
    scf.if %2 {
      %cst_13 = arith.constant 0.000000e+00 : f32
      %29 = vector.broadcast %cst_13 : f32 to vector<16x128xf32>
      %c0_14 = arith.constant 0 : index
      %c0_15 = arith.constant 0 : index
      %30 = vector.load %arg6[%c0_14, %c0_15] : memref<16x128xf32, #tpu.memory_space<vmem>>, vector<16x128xf32>
      tpu.vector_store %arg6[%c0_14, %c0_15], %29 {strides = array<i32>} : memref<16x128xf32, #tpu.memory_space<vmem>>, vector<16x128xf32>,
    } else {
    }
    %c0 = arith.constant 0 : index
    %c0_1 = arith.constant 0 : index
    %3 = vector.load %arg3[%c0, %c0_1] : memref<16x128xf32, #tpu.memory_space<vmem>>, vector<16x128xf32>
    %4 = arith.truncf %3 : vector<16x128xf32> to vector<16x128xbf16>
    %c0_2 = arith.constant 0 : index
    %c0_3 = arith.constant 0 : index
    %5 = vector.load %arg4[%c0_2, %c0_3] : memref<128x128xf32, #tpu.memory_space<vmem>>, vector<128x128xf32>
    %6 = arith.truncf %5 : vector<128x128xf32> to vector<128x128xbf16>
    %c128_i32 = arith.constant 128 : i32
    %7 = arith.muli %arg2, %c128_i32 : i32
    %8 = tpu.iota {dimensions = array<i32: 1>} : vector<16x128xi32>
    %9 = vector.broadcast %7 : i32 to vector<16x128xi32>
    %10 = arith.addi %8, %9 : vector<16x128xi32>
    %c32_i32 = arith.constant 32 : i32
    %11 = vector.broadcast %c32_i32 : i32 to vector<16x128xi32>
    %12 = arith.cmpi slt, %10, %11 : vector<16x128xi32>
    %cst = arith.constant 0.000000e+00 : bf16
    %13 = vector.broadcast %cst : bf16 to vector<16x128xbf16>
    %14 = arith.select %12, %4, %13 : vector<16x128xi1>, vector<16x128xbf16>
    %15 = tpu.iota {dimensions = array<i32: 0>} : vector<128x128xi32>
    %16 = vector.broadcast %7 : i32 to vector<128x128xi32>
    %17 = arith.addi %15, %16 : vector<128x128xi32>
    %c32_i32_4 = arith.constant 32 : i32
    %18 = vector.broadcast %c32_i32_4 : i32 to vector<128x128xi32>
    %19 = arith.cmpi slt, %17, %18 : vector<128x128xi32>
    %cst_5 = arith.constant 0.000000e+00 : bf16
    %20 = vector.broadcast %cst_5 : bf16 to vector<128x128xbf16>
    %21 = arith.select %19, %6, %20 : vector<128x128xi1>, vector<128x128xbf16>
    %c0_6 = arith.constant 0 : index
    %c0_7 = arith.constant 0 : index
    %22 = vector.load %arg6[%c0_6, %c0_7] : memref<16x128xf32, #tpu.memory_space<vmem>>, vector<16x128xf32>
    %cst_8 = arith.constant dense<0.000000e+00> : vector<16x128xf32>
    %23 = tpu.matmul %14, %21, %cst_8 {dimension_numbers = #tpu.dot_dimension_numbers<[1], [0], [0], [1], [0, 0, 1, 1], [], []>} : vector<16x128xbf16>, vector<128x128xbf16>, vector<16x128xf32> -> vector<16x128xf32>
    %24 = arith.addf %22, %23 : vector<16x128xf32>
    %c0_9 = arith.constant 0 : index
    %c0_10 = arith.constant 0 : index
    %25 = vector.load %arg6[%c0_9, %c0_10] : memref<16x128xf32, #tpu.memory_space<vmem>>, vector<16x128xf32>
    tpu.vector_store %arg6[%c0_9, %c0_10], %24 {strides = array<i32>} : memref<16x128xf32, #tpu.memory_space<vmem>>, vector<16x128xf32>,
    %c0_i32_11 = arith.constant 0 : i32
    %26 = arith.cmpi eq, %arg2, %c0_i32_11 : i32
    %27 = arith.extui %26 : i1 to i32
    %c0_i32_12 = arith.constant 0 : i32
    %28 = arith.cmpi ne, %27, %c0_i32_12 : i32
    scf.if %28 {
      %c0_13 = arith.constant 0 : index
      %c0_14 = arith.constant 0 : index
      %29 = vector.load %arg6[%c0_13, %c0_14] : memref<16x128xf32, #tpu.memory_space<vmem>>, vector<16x128xf32>
      %c0_15 = arith.constant 0 : index
      %c0_16 = arith.constant 0 : index
      %30 = vector.load %arg5[%c0_15, %c0_16] : memref<1x128xf32, #tpu.memory_space<vmem>>, vector<1x128xf32>
      %31 = vector.broadcast %30 : vector<1x128xf32> to vector<16x128xf32>
      %32 = arith.addf %29, %31 : vector<16x128xf32>
      %33 = arith.mulf %32, %32 : vector<16x128xf32>
      %c0_17 = arith.constant 0 : index
      %c0_18 = arith.constant 0 : index
      %34 = vector.load %arg6[%c0_17, %c0_18] : memref<16x128xf32, #tpu.memory_space<vmem>>, vector<16x128xf32>
      tpu.vector_store %arg6[%c0_17, %c0_18], %33 {strides = array<i32>} : memref<16x128xf32, #tpu.memory_space<vmem>>, vector<16x128xf32>,
    } else {
    }
    return
  }
  func.func @transform_0(%arg0: i32, %arg1: i32, %arg2: i32) -> (i32, i32) {
    %c0_i32 = arith.constant 0 : i32
    return %arg0, %arg2 : i32, i32
  }
  func.func @transform_1(%arg0: i32, %arg1: i32, %arg2: i32) -> (i32, i32) {
    %c0_i32 = arith.constant 0 : i32
    return %arg2, %arg1 : i32, i32
  }
  func.func @transform_2(%arg0: i32, %arg1: i32, %arg2: i32) -> (i32, i32) {
    %c0_i32 = arith.constant 0 : i32
    %c0_i32_0 = arith.constant 0 : i32
    return %c0_i32, %arg1 : i32, i32
  }
  func.func @transform_3(%arg0: i32, %arg1: i32, %arg2: i32) -> (i32, i32) {
    %c0_i32 = arith.constant 0 : i32
    return %arg0, %arg1 : i32, i32
  }
}

</mosaic_0001>

<bundles_post_ra>
// kernel: tpu_custom_call.1
= control target key start
LH: loop header
LB: loop body
LE: loop exit
PB: predicated region body
PF: predicated region fallthrough
CT: control target
= control target key end

     0   :  { %8 = vsyncpa [#allocation3], 0  ;;  %s464_s0 = inlined_call_operand.hbm [shape: f32[8,32], index: 0, kind: input, shape index: {}]   ;;  %s465_s1 = inlined_call_operand.hbm [shape: f32[32,128], index: 1, kind: input, shape index: {}]   ;;  %s466_s2 = inlined_call_operand.vmem [shape: f32[1,128], index: 2, kind: input, shape index: {}]   ;;  %s467_s3 = inlined_call_operand.hbm [shape: f32[8,128], index: 3, kind: output, shape index: {}]  }
   0x1   :  { %9 = vsyncpa [#allocation6], 0 }
   0x2   :  { %10 = vsyncpa [#allocation4], 0 }
   0x3   :  { %14 = vsyncadd [#allocation3], 128  ;;  %s15_s14 = sshll.u32 %s464_s0, 4  ;;  %s376_s15 = smov [#allocation2]   ;;  %s16_s14 = int_to_ptr.hbm [resolvable:$true] %s15_s14 }
   0x4   :  { %s17_s16 = sshll.u32 %s376_s15, 4  ;;  %s377_s17 = smov 128   ;;  %s18_s16 = int_to_ptr.vmem [resolvable:$true] %s17_s16 }
   0x5   :  { %s378_s18 = smov 8  }
   0x6   :  { %23 = dma.hbm_to_vmem [thread:$0]  %s16_s14, 128, %s18_s16, [#allocation3], %s377_s17, %s377_s17, %s378_s18  }
   0x7   :  { %27 = vsyncadd [#allocation6], 1536  ;;  %s28_s21 = sshll.u32 %s465_s1, 4  ;;  %s379_s22 = smov [#allocation5]   ;;  %s29_s21 = int_to_ptr.hbm [resolvable:$true] %s28_s21 }
   0x8   :  { %s30_s23 = sshll.u32 %s379_s22, 4  ;;  %s31_s23 = int_to_ptr.vmem [resolvable:$true] %s30_s23 }
   0x9   :  { %36 = dma.hbm_to_vmem [thread:$0]  %s29_s21, 512, %s31_s23, [#allocation6], %s377_s17, %s377_s17, %s378_s18  }
   0xa   :  { %370 = dma.done.wait [#allocation3], 256  }
   0xb   :  { %371 = vsyncadd [#allocation3], 4294967040 }
   0xc   :  { %372 = dma.done.wait [#allocation6], 2048  }
   0xd   :  { %373 = vsyncadd [#allocation6], 4294965248  ;;  %vm380_vm0 = vmmov 0   ;;  %v72_v1 = vld [vmem:[#allocation5 + $0x70] sm:$0xff]  ;;  %v73_v2 = vld [vmem:[#allocation5 + $0x78] sm:$0xff]  ;;  %v91_v48 = vlaneseq  ;;  %vm381_vm2 = vmmov 1  }
   0xe   :  { %vm415_vm1 = vmpackc.low %vm380_vm0, %vm380_vm0  ;;  %v70_v3 = vld [vmem:[#allocation5 + $0x60] sm:$0xff]  ;;  %v88_v4 = vpack.c.bf16 %v72_v1, %v72_v1  ;;  %v89_v5 = vpack.c.bf16 %v73_v2, %v73_v2  ;;  %v71_v6 = vld [vmem:[#allocation5 + $0x68] sm:$0xff] }
   0xf   :  { %v86_v7 = vpack.c.bf16 %v70_v3, %v70_v3  ;;  %v68_v8 = vld [vmem:[#allocation5 + $0x50] sm:$0xff]  ;;  %v69_v9 = vld [vmem:[#allocation5 + $0x58] sm:$0xff]  ;;  %v87_v10 = vpack.c.bf16 %v71_v6, %v71_v6  ;;  %v66_v13 = vld [vmem:[#allocation5 + $0x40] sm:$0xff]  ;;  %v92_v59 = vand.u32 127, %v91_v48 }
  0x10   :  { %v84_v11 = vpack.c.bf16 %v68_v8, %v68_v8  ;;  %v85_v12 = vpack.c.bf16 %v69_v9, %v69_v9  ;;  %v67_v14 = vld [vmem:[#allocation5 + $0x48] sm:$0xff]  ;;  %v178_v15 = vsel %vm415_vm1, %v88_v4, 0  ;;  %v179_v16 = vsel %vm415_vm1, %v89_v5, 0  ;;  %v64_v28 = vld [vmem:[#allocation5 + $0x30] sm:$0xff]  ;;  %v65_v29 = vld [vmem:[#allocation5 + $0x38] sm:$0xff] }
  0x11   :  { %v176_v17 = vsel %vm415_vm1, %v86_v7, 0  ;;  %v82_v18 = vpack.c.bf16 %v66_v13, %v66_v13  ;;  %v218_v19 = vunpack.c.l.b16 %v178_v15  ;;  %v219_v20 = vunpack.c.l.b16 %v179_v16  ;;  %v62_v37 = vld [vmem:[#allocation5 + $0x20] sm:$0xff]  ;;  %v63_v38 = vld [vmem:[#allocation5 + $0x28] sm:$0xff]  ;;  %v60_v43 = vld [vmem:[#allocation5 + $0x10] sm:$0xff] }
  0x12   :  { %v177_v21 = vsel %vm415_vm1, %v87_v10, 0  ;;  %v216_v22 = vunpack.c.l.b16 %v176_v17  ;;  %v174_v24 = vsel %vm415_vm1, %v84_v11, 0  ;;  %v175_v25 = vsel %vm415_vm1, %v85_v12, 0  ;;  %v61_v44 = vld [vmem:[#allocation5 + $0x18] sm:$0xff]  ;;  %vm443_vm3 = vmpackc.low %vm381_vm2, %vm381_vm2  ;;  %v58_v57 = vld [vmem:[#allocation5] sm:$0xff] }
  0x13   :  { %v217_v23 = vunpack.c.l.b16 %v177_v21  ;;  %v83_v26 = vpack.c.bf16 %v67_v14, %v67_v14  ;;  %v227_v27 = vpack.c.b16 %v219_v20, %v218_v19  ;;  %v214_v31 = vunpack.c.l.b16 %v174_v24  ;;  %v59_v58 = vld [vmem:[#allocation5 + $0x8] sm:$0xff]  ;;  %v54_v3 = vld [vmem:[#allocation2] sm:$0xff]  ;;  %v55_v4 = vld [vmem:[#allocation2 + $0x8] sm:$0xff] }
  0x14   :  { %v215_v32 = vunpack.c.l.b16 %v175_v25  ;;  %v172_v33 = vsel %vm415_vm1, %v82_v18, 0  ;;  %v80_v35 = vpack.c.bf16 %v64_v28, %v64_v28  ;;  %v81_v36 = vpack.c.bf16 %v65_v29, %v65_v29  ;;  %v297_v21 = vld [vmem:[%s466_s2] ss:$0 sm:$0xff] }
  0x15   :  { %236 = vmatpush.bf16.msra.mxu0 %v227_v27  ;;  %v226_v30 = vpack.c.b16 %v217_v23, %v216_v22  ;;  %v173_v34 = vsel %vm415_vm1, %v83_v26, 0  ;;  %v212_v40 = vunpack.c.l.b16 %v172_v33  ;;  %v78_v42 = vpack.c.bf16 %v62_v37, %v62_v37 }
  0x16   :  { %v225_v39 = vpack.c.b16 %v215_v32, %v214_v31  ;;  %v213_v41 = vunpack.c.l.b16 %v173_v34  ;;  %v170_v45 = vsel %vm415_vm1, %v80_v35, 0  ;;  %v171_v46 = vsel %vm415_vm1, %v81_v36, 0 }
  0x17   :  { %v79_v47 = vpack.c.bf16 %v63_v38, %v63_v38  ;;  %v76_v49 = vpack.c.bf16 %v60_v43, %v60_v43  ;;  %v77_v50 = vpack.c.bf16 %v61_v44, %v61_v44  ;;  %v210_v52 = vunpack.c.l.b16 %v170_v45 }
  0x18   :  { %v224_v51 = vpack.c.b16 %v213_v41, %v212_v40  ;;  %v211_v53 = vunpack.c.l.b16 %v171_v46  ;;  %v168_v54 = vsel %vm415_vm1, %v78_v42, 0  ;;  %v74_v0 = vpack.c.bf16 %v58_v57, %v58_v57 }
  0x19   :  { %237 = vmatpush.bf16.msra.mxu0 %v226_v30  ;;  %v169_v55 = vsel %vm415_vm1, %v79_v47, 0  ;;  %v208_v60 = vunpack.c.l.b16 %v168_v54  ;;  %v166_v63 = vsel %vm443_vm3, %v76_v49, 0  ;;  %v167_v1 = vsel %vm443_vm3, %v77_v50, 0 }
  0x1a   :  { %v223_v61 = vpack.c.b16 %v211_v53, %v210_v52  ;;  %v209_v62 = vunpack.c.l.b16 %v169_v55  ;;  %v75_v2 = vpack.c.bf16 %v59_v58, %v59_v58  ;;  %vm95_vm4 = vcmp.lt.s32.totalorder %v92_v59, 32 }
  0x1b   :  { %v206_v5 = vunpack.c.l.b16 %v166_v63  ;;  %v207_v6 = vunpack.c.l.b16 %v167_v1  ;;  %v56_v8 = vpack.c.bf16 %v54_v3, %v54_v3  ;;  %v57_v9 = vpack.c.bf16 %v55_v4, %v55_v4  ;;  %vm96_vm5 = vmpackc.low %vm95_vm4, %vm95_vm4 }
  0x1c   :  { %v222_v7 = vpack.c.b16 %v209_v62, %v208_v60  ;;  %v164_v10 = vsel %vm443_vm3, %v74_v0, 0  ;;  %v165_v11 = vsel %vm443_vm3, %v75_v2, 0 }
  0x1d   :  { %238 = vmatpush.bf16.msra.mxu0 %v225_v39  ;;  %v221_v12 = vpack.c.b16 %v207_v6, %v206_v5  ;;  %v204_v13 = vunpack.c.l.b16 %v164_v10  ;;  %v205_v14 = vunpack.c.l.b16 %v165_v11  ;;  %v97_v15 = vsel %vm96_vm5, %v56_v8, 0 }
  0x1e   :  { %v98_v16 = vsel %vm96_vm5, %v57_v9, 0  ;;  %v184_v17 = vunpack.c.l.b16 %v97_v15 }
  0x1f   :  { %v185_v18 = vunpack.c.l.b16 %v98_v16  ;;  %v220_v19 = vpack.c.b16 %v205_v14, %v204_v13 }
  0x21   :  { %239 = vmatpush.bf16.msra.mxu0 %v224_v51  ;;  %v186_v20 = vpack.c.b16 %v185_v18, %v184_v17 }
  0x25   :  { %240 = vmatpush.bf16.msra.mxu0 %v223_v61 }
  0x29   :  { %241 = vmatpush.bf16.msra.mxu0 %v222_v7 }
  0x2d   :  { %242 = vmatpush.bf16.msra.mxu0 %v221_v12 }
  0x31   :  { %243 = vmatpush.bf16.msra.mxu0 %v220_v19 }
  0x34   :  { %244 = vmatmul.bf16.vlgmr.msra.gmra.mxu0 %v186_v20 }
  0xb1   :  { %v245_v22 = vpop.f32.mrf.mxu0 }
  0xb2   :  { %v263_v23 = vadd.f32 %v297_v21, %v245_v22 }
  0xb4   :  { %v265_v24 = vmul.f32 %v263_v23, %v263_v23 }
  0xb6   :  { %267 = vst [vmem:[#allocation7] sm:$0xff] %v265_v24 }
  0xb9   :  { %v247_v25 = vpop.f32.mrf.mxu0 }
  0xba   :  { %v264_v26 = vadd.f32 %v297_v21, %v247_v25 }
  0xbc   :  { %v266_v27 = vmul.f32 %v264_v26, %v264_v26 }
  0xbe   :  { %268 = vst [vmem:[#allocation7 + $0x8] sm:$0xff] %v266_v27 }
  0xbf   :  { %272 = vsyncadd [#allocation4], 128  ;;  %s275_s26 = sshll.u32 %s467_s3, 4  ;;  %s382_s27 = smov [#allocation7]   ;;  %s276_s26 = int_to_ptr.hbm [resolvable:$true] %s275_s26 }
  0xc0   :  { %s273_s28 = sshll.u32 %s382_s27, 4  ;;  %s274_s28 = int_to_ptr.vmem [resolvable:$true] %s273_s28 }
  0xc1   :  { %281 = dma.vmem_to_hbm [thread:$0]  %s274_s28, 128, %s276_s26, [#allocation4], %s377_s17, %s377_s17, %s378_s18  }
  0xc2   :  { %374 = dma.done.wait [#allocation4], 256  }
  0xc3   :  { %375 = vsyncadd [#allocation4], 4294967040 }
  0xc4   :  { %286 = vsyncpa [#allocation3], 1 }
  0xc5   :  { %287 = vsyncpa [#allocation6], 1 }
  0xc6   :  { %288 = vsyncpa [#allocation4], 1 }

</bundles_post_ra>
